<compile_context>
chip_gen: v7x
topology: tpu7x:2x2x1
jax: 0.10.0
libtpu: 0.0.40
codegen_flags: <defaults>
</compile_context>

<pallas_src>
import jax
import jax.numpy as jnp
from jax import lax
from jax.experimental import pallas as pl
from jax.experimental.pallas import tpu as pltpu


LANE = 128
MAX_TB = 8192  # lane-tile cap (multiple of 128)


def agent_kernel(x_ref, w1_ref, b1_ref, w2_ref, b2_ref, o_ref):
    # x_ref : (1, TB)    w1_ref: (64, 1)   b1_ref: (64, 1)
    # w2_ref: (64, 3)    b2_ref: (3, 1)    o_ref : (3, TB)
    x = x_ref[...]                                            # (1, TB)

    # Layer 1: Linear(1, 64) + ReLU.  K=1 contraction == outer product,
    # so one VPU broadcast multiply-add (no MXU push for K=1).
    h = jnp.maximum(w1_ref[...] * x + b1_ref[...], 0.0)      # (64, TB)

    # Layer 2: Linear(64, 3) on the MXU: contract the 64-feature axis of
    # w2 (64, 3) against h (64, TB) -> (3, TB).
    scores = lax.dot_general(
        w2_ref[...], h,
        (((0,), (0,)), ((), ())),
        preferred_element_type=jnp.float32,
    ) + b2_ref[...]                                           # (3, TB)

    # Numerically stable softmax over the 3 action rows (sublane axis).
    m = jnp.max(scores, axis=0, keepdims=True)                # (1, TB)
    e = jnp.exp(scores - m)                                   # (3, TB)
    denom = jnp.sum(e, axis=0, keepdims=True)                 # (1, TB)
    # Exact division (EUP/VPU have huge slack here); keeps sum-to-1 exact.
    o_ref[...] = (e / denom).astype(o_ref.dtype)


def _round_up(n, m):
    return ((n + m - 1) // m) * m


def agent_forward(x, w1, b1, w2, b2):
    """x: (B, 1) float32 -> (B, 3) float32 softmax probabilities."""
    B = x.shape[0]

    B_lane = _round_up(B, LANE)
    if B_lane <= LANE:
        TB = LANE
    else:
        # Keep >= 2 grid steps so the "parallel" batch axis can shard across
        # v7x's two TensorCores; cap each tile at MAX_TB lanes.
        TB = min(MAX_TB, _round_up(pl.cdiv(B_lane, 2), LANE))
    B_pad = _round_up(B_lane, TB)
    grid = (B_pad // TB,)

    # Layout plumbing: batch -> lane (last) axis, features -> sublanes.
    # Padded lanes are zeros; they produce a harmless softmax that is sliced
    # off below (never read by the caller).
    x_t = jnp.pad(x.reshape(1, B).astype(jnp.float32), ((0, 0), (0, B_pad - B)))
    w1_col = w1.reshape(64, 1).astype(jnp.float32)
    b1_col = b1.reshape(64, 1).astype(jnp.float32)
    w2_f = w2.astype(jnp.float32)                  # (64, 3)
    b2_col = b2.reshape(3, 1).astype(jnp.float32)

    cost = pl.CostEstimate(
        flops=int(B_pad) * (2 * 64 + 2 * 64 * 3 + 16),
        transcendentals=int(B_pad) * 3,            # 3x exp per batch column
        bytes_accessed=4 * (4 * int(B_pad) + 64 + 64 + 64 * 3 + 3),
    )

    out = pl.pallas_call(
        agent_kernel,
        out_shape=jax.ShapeDtypeStruct((3, B_pad), jnp.float32),
        grid=grid,
        in_specs=[
            pl.BlockSpec((1, TB), lambda i: (0, i)),   # activations: tiled over batch
            pl.BlockSpec((64, 1), lambda i: (0, 0)),   # weights stay VMEM-resident
            pl.BlockSpec((64, 1), lambda i: (0, 0)),
            pl.BlockSpec((64, 3), lambda i: (0, 0)),
            pl.BlockSpec((3, 1), lambda i: (0, 0)),
        ],
        out_specs=pl.BlockSpec((3, TB), lambda i: (0, i)),
        compiler_params=pltpu.CompilerParams(
            dimension_semantics=("parallel",),         # batch axis -> both TCs on v7x
            vmem_limit_bytes=40 * 1024 * 1024,         # clears v5e's 16 MiB default,
                                                       # inside v7x's 64 MiB physical
        ),
        cost_estimate=cost,
    )(x_t, w1_col, b1_col, w2_f, b2_col)

    # Back to PyTorch layout (B, 3).
    # TODO(synk): consumers that can accept feature-major (3, B) output and a
    # (1, B) input should call the pallas_call directly and skip this relayout.
    return out[:, :B].T


def init_params(key):
    """Deterministic init mimicking nn.Linear default U[-1/sqrt(fan_in), +1/sqrt(fan_in)]."""
    k1, k2, k3, k4 = jax.random.split(key, 4)
    bound1 = 1.0
    bound2 = 1.0 / (64 ** 0.5)
    # Stored (in_features, out_features) so x @ W matches PyTorch's x @ W.T.
    w1 = jax.random.uniform(k1, (1, 64), jnp.float32, -bound1, bound1)
    b1 = jax.random.uniform(k2, (64,), jnp.float32, -bound1, bound1)
    w2 = jax.random.uniform(k3, (64, 3), jnp.float32, -bound2, bound2)
    b2 = jax.random.uniform(k4, (3,), jnp.float32, -bound2, bound2)
    return w1, b1, w2, b2


def _reference(x, w1, b1, w2, b2):
    h = jnp.maximum(x @ w1 + b1, 0.0)
    return jax.nn.softmax(h @ w2 + b2, axis=-1)


if __name__ == "__main__":
    key = jax.random.PRNGKey(0)
    k_params, k_x1, k_x2 = jax.random.split(key, 3)

    w1, b1, w2, b2 = init_params(k_params)

    # Small batch of scalar states, as Linear(1, 64) implies.
    B = 8
    x = jax.random.normal(k_x1, (B, 1), jnp.float32)

    probs = agent_forward(x, w1, b1, w2, b2)
    probs = jax.block_until_ready(probs)

    ref = _reference(x, w1, b1, w2, b2)
    assert probs.shape == (B, 3)
    assert jnp.allclose(probs, ref, atol=1e-4, rtol=1e-4)
    # Exact softmax normalization (no approx reciprocal anymore).
    assert jnp.allclose(jnp.sum(probs, axis=-1), 1.0, atol=1e-5)

    # Exercise the padded / multi-tile batch path too (grid >= 2).
    B2 = 300
    x2 = jax.random.normal(k_x2, (B2, 1), jnp.float32)
    probs2 = jax.block_until_ready(agent_forward(x2, w1, b1, w2, b2))
    ref2 = _reference(x2, w1, b1, w2, b2)
    assert probs2.shape == (B2, 3)
    assert jnp.allclose(probs2, ref2, atol=1e-4, rtol=1e-4)
    assert jnp.allclose(jnp.sum(probs2, axis=-1), 1.0, atol=1e-5)

    print("KERNEL_OK")
</pallas_src>

<mosaic_0001>
module attributes {stable_mosaic.version = 11 : i64} {
  func.func @agent_kernel(%arg0: i32, %arg1: memref<1x128xf32, #tpu.memory_space<vmem>>, %arg2: memref<64x1xf32, #tpu.memory_space<vmem>>, %arg3: memref<64x1xf32, #tpu.memory_space<vmem>>, %arg4: memref<64x3xf32, #tpu.memory_space<vmem>>, %arg5: memref<3x1xf32, #tpu.memory_space<vmem>>, %arg6: memref<3x128xf32, #tpu.memory_space<vmem>>) attributes {dimension_semantics = [#tpu.dimension_semantics<parallel>], iteration_bounds = array<i64: 1>, scalar_prefetch = 0 : i64, scratch_operands = 0 : i64, tpu.core_type = #tpu.core_type<tc>, window_params = [{transform_indices = @transform_0, window_bounds = array<i64: 1, 128>}, {pipeline_mode = #tpu.pipeline_mode<synchronous>, transform_indices = @transform_1, window_bounds = array<i64: 64, 1>}, {pipeline_mode = #tpu.pipeline_mode<synchronous>, transform_indices = @transform_2, window_bounds = array<i64: 64, 1>}, {pipeline_mode = #tpu.pipeline_mode<synchronous>, transform_indices = @transform_3, window_bounds = array<i64: 64, 3>}, {pipeline_mode = #tpu.pipeline_mode<synchronous>, transform_indices = @transform_4, window_bounds = array<i64: 3, 1>}, {transform_indices = @transform_5, window_bounds = array<i64: 3, 128>}]} {
    %c0 = arith.constant 0 : index
    %c0_0 = arith.constant 0 : index
    %0 = vector.load %arg1[%c0, %c0_0] : memref<1x128xf32, #tpu.memory_space<vmem>>, vector<1x128xf32>
    %c0_1 = arith.constant 0 : index
    %c0_2 = arith.constant 0 : index
    %1 = vector.load %arg2[%c0_1, %c0_2] : memref<64x1xf32, #tpu.memory_space<vmem>>, vector<64x1xf32>
    %2 = vector.broadcast %1 : vector<64x1xf32> to vector<64x128xf32>
    %3 = vector.broadcast %0 : vector<1x128xf32> to vector<64x128xf32>
    %4 = arith.mulf %2, %3 : vector<64x128xf32>
    %c0_3 = arith.constant 0 : index
    %c0_4 = arith.constant 0 : index
    %5 = vector.load %arg3[%c0_3, %c0_4] : memref<64x1xf32, #tpu.memory_space<vmem>>, vector<64x1xf32>
    %6 = vector.broadcast %5 : vector<64x1xf32> to vector<64x128xf32>
    %7 = arith.addf %4, %6 : vector<64x128xf32>
    %cst = arith.constant 0.000000e+00 : f32
    %8 = vector.broadcast %cst : f32 to vector<64x128xf32>
    %9 = arith.maximumf %7, %8 : vector<64x128xf32>
    %c0_5 = arith.constant 0 : index
    %c0_6 = arith.constant 0 : index
    %10 = vector.load %arg4[%c0_5, %c0_6] : memref<64x3xf32, #tpu.memory_space<vmem>>, vector<64x3xf32>
    %cst_7 = arith.constant dense<0.000000e+00> : vector<3x128xf32>
    %11 = tpu.matmul %10, %9, %cst_7 {dimension_numbers = #tpu.dot_dimension_numbers<[0], [0], [1], [1], [0, 1, 1, 1], [], []>} : vector<64x3xf32>, vector<64x128xf32>, vector<3x128xf32> -> vector<3x128xf32>
    %c0_8 = arith.constant 0 : index
    %c0_9 = arith.constant 0 : index
    %12 = vector.load %arg5[%c0_8, %c0_9] : memref<3x1xf32, #tpu.memory_space<vmem>>, vector<3x1xf32>
    %13 = vector.broadcast %12 : vector<3x1xf32> to vector<3x128xf32>
    %14 = arith.addf %11, %13 : vector<3x128xf32>
    %cst_10 = arith.constant dense<0xFF800000> : vector<128xf32>
    %15 = vector.multi_reduction <maximumf>, %14, %cst_10 [0] : vector<3x128xf32> to vector<128xf32>
    %16 = vector.shape_cast %15 : vector<128xf32> to vector<1x128xf32>
    %17 = vector.broadcast %16 : vector<1x128xf32> to vector<3x128xf32>
    %18 = arith.subf %14, %17 : vector<3x128xf32>
    %19 = math.exp %18 : vector<3x128xf32>
    %cst_11 = arith.constant dense<0.000000e+00> : vector<128xf32>
    %20 = vector.multi_reduction <add>, %19, %cst_11 [0] : vector<3x128xf32> to vector<128xf32>
    %21 = vector.shape_cast %20 : vector<128xf32> to vector<1x128xf32>
    %22 = vector.broadcast %21 : vector<1x128xf32> to vector<3x128xf32>
    %23 = arith.divf %19, %22 : vector<3x128xf32>
    %c0_12 = arith.constant 0 : index
    %c0_13 = arith.constant 0 : index
    %24 = vector.load %arg6[%c0_12, %c0_13] : memref<3x128xf32, #tpu.memory_space<vmem>>, vector<3x128xf32>
    tpu.vector_store %arg6[%c0_12, %c0_13], %23 {strides = array<i32>} : memref<3x128xf32, #tpu.memory_space<vmem>>, vector<3x128xf32>,
    return
  }
  func.func @transform_0(%arg0: i32) -> (i32, i32) {
    %c0_i32 = arith.constant 0 : i32
    %c0_i32_0 = arith.constant 0 : i32
    return %c0_i32, %arg0 : i32, i32
  }
  func.func @transform_1(%arg0: i32) -> (i32, i32) {
    %c0_i32 = arith.constant 0 : i32
    %c0_i32_0 = arith.constant 0 : i32
    %c0_i32_1 = arith.constant 0 : i32
    return %c0_i32, %c0_i32_0 : i32, i32
  }
  func.func @transform_2(%arg0: i32) -> (i32, i32) {
    %c0_i32 = arith.constant 0 : i32
    %c0_i32_0 = arith.constant 0 : i32
    %c0_i32_1 = arith.constant 0 : i32
    return %c0_i32, %c0_i32_0 : i32, i32
  }
  func.func @transform_3(%arg0: i32) -> (i32, i32) {
    %c0_i32 = arith.constant 0 : i32
    %c0_i32_0 = arith.constant 0 : i32
    %c0_i32_1 = arith.constant 0 : i32
    return %c0_i32, %c0_i32_0 : i32, i32
  }
  func.func @transform_4(%arg0: i32) -> (i32, i32) {
    %c0_i32 = arith.constant 0 : i32
    %c0_i32_0 = arith.constant 0 : i32
    %c0_i32_1 = arith.constant 0 : i32
    return %c0_i32, %c0_i32_0 : i32, i32
  }
  func.func @transform_5(%arg0: i32) -> (i32, i32) {
    %c0_i32 = arith.constant 0 : i32
    %c0_i32_0 = arith.constant 0 : i32
    return %c0_i32, %arg0 : i32, i32
  }
}

</mosaic_0001>

<bundles_post_ra>
// kernel: tpu_custom_call.1
= control target key start
LH: loop header
LB: loop body
LE: loop exit
PB: predicated region body
PF: predicated region fallthrough
CT: control target
= control target key end

     0   :  { %v380_v2 = vmov 0   ;;  %s509_s0 = inlined_call_operand.vmem [shape: f32[1,128], index: 0, kind: input, shape index: {}]   ;;  %s510_s1 = inlined_call_operand.vmem [shape: f32[64,1], index: 1, kind: input, shape index: {}]   ;;  %s511_s2 = inlined_call_operand.vmem [shape: f32[64,1], index: 2, kind: input, shape index: {}]   ;;  %s512_s3 = inlined_call_operand.vmem [shape: f32[64,3], index: 3, kind: input, shape index: {}]   ;;  %s513_s4 = inlined_call_operand.vmem [shape: f32[3,1], index: 4, kind: input, shape index: {}]   ;;  %s514_s5 = inlined_call_operand.hbm [shape: f32[3,128], index: 5, kind: output, shape index: {}]  }
   0x1   :  { %v84_v0 = vld [vmem:[%s511_s2] sm:$0xff]  ;;  %351 = vset.pattern.permute.xlu1 %v380_v2  ;;  %350 = vset.pattern.permute.xlu0 %v380_v2  ;;  %v85_v3 = vld [vmem:[%s511_s2 + $0x8] sm:$0xff]  ;;  %v25_v5 = vld [vmem:[%s510_s1 + $0x18] sm:$0xff] }
   0x2   :  { %v22_v1 = vld [vmem:[%s510_s1] sm:$0xff]  ;;  %94 = vperm.xlu1 %351, %v84_v0   ;;  %v23_v4 = vld [vmem:[%s510_s1 + $0x8] sm:$0xff]  ;;  %v24_v6 = vld [vmem:[%s510_s1 + $0x10] sm:$0xff] }
   0x3   :  { %32 = vperm.xlu0 %350, %v22_v1  }
   0x6   :  { %99 = vperm.xlu1 %351, %v85_v3  }
   0x7   :  { %37 = vperm.xlu0 %350, %v23_v4  }
   0x8   :  { %10 = vsyncpa [#allocation3], 0  ;;  %v87_v7 = vld [vmem:[%s511_s2 + $0x18] sm:$0xff]  ;;  %v86_v8 = vld [vmem:[%s511_s2 + $0x10] sm:$0xff]  ;;  %v381_v9 = vmov 0.0|0.0   ;;  %vm382_vm0 = vmmov 0  }
   0x9   :  { %333 = vmatprep.subr.bf16.mxu0 %v381_v9  ;;  %v27_v10 = vld [vmem:[%s510_s1 + $0x28] sm:$0xff]  ;;  %v26_v11 = vld [vmem:[%s510_s1 + $0x20] sm:$0xff]  ;;  %v29_v14 = vld [vmem:[%s510_s1 + $0x38] sm:$0xff]  ;;  %v383_v19 = vmov 0.0   ;;  %vm194_vm1 = vcmask 523264   ;;  %vm268_vm2 = vcmask 1042432  }
   0xa   :  { %47 = vperm.xlu1 %351, %v25_v5   ;;  %v89_v12 = vld [vmem:[%s511_s2 + $0x28] sm:$0xff]  ;;  %v88_v13 = vld [vmem:[%s511_s2 + $0x20] sm:$0xff]  ;;  %v28_v15 = vld [vmem:[%s510_s1 + $0x30] sm:$0xff]  ;;  %330 = vmatprep.mubr.msk.f32.mxu0 %vm382_vm0, %v383_v19 }
   0xb   :  { %42 = vperm.xlu0 %350, %v24_v6   ;;  %v91_v16 = vld [vmem:[%s511_s2 + $0x38] sm:$0xff]  ;;  %v90_v17 = vld [vmem:[%s511_s2 + $0x30] sm:$0xff]  ;;  %v156_v18 = vld [vmem:[%s513_s4] sm:$0x7] }
   0xc   :  { %v148_v20 = vld [vmem:[%s512_s3] sm:$0xff]  ;;  %v149_v21 = vld [vmem:[%s512_s3 + $0x8] sm:$0xff]  ;;  %v150_v22 = vld [vmem:[%s512_s3 + $0x10] sm:$0xff] }
   0xd   :  { %v151_v23 = vld [vmem:[%s512_s3 + $0x18] sm:$0xff]  ;;  %v152_v24 = vld [vmem:[%s512_s3 + $0x20] sm:$0xff]  ;;  %v153_v25 = vld [vmem:[%s512_s3 + $0x28] sm:$0xff] }
   0xe   :  { %109 = vperm.xlu1 %351, %v87_v7   ;;  %v154_v26 = vld [vmem:[%s512_s3 + $0x30] sm:$0xff]  ;;  %v155_v27 = vld [vmem:[%s512_s3 + $0x38] sm:$0xff]  ;;  %v303_v28 = vld [vmem:[%s509_s0] ss:$0 sm:$0xff]  ;;  %s384_s0 = smov [#allocation2]  }
   0xf   :  { %104 = vperm.xlu0 %350, %v86_v8   ;;  %s295_s3 = sshll.u32 %s384_s0, 4  ;;  %s296_s3 = int_to_ptr.vmem [resolvable:$true] %s295_s3 }
  0x10   :  { %s356_s17 = scalar_lea.vmem %s296_s3, 64  ;;  %p361_p1 = scmp.lt.s32.totalorder %s296_s3, %s296_s3 }
  0x11   :  { %p357_p0 = scmp.ne.s32.totalorder %s296_s3, %s356_s17  ;;  %p362_p2 = scmp.lt.s32.totalorder %s356_s17, %s356_s17 }
  0x12   :  { %57 = vperm.xlu1 %351, %v27_v10  }
  0x13   :  { %52 = vperm.xlu0 %350, %v26_v11   ;;  %p363_p3 = por %p362_p2, %p361_p1 }
  0x15   :  { %p364_p4 = pnand %p363_p3, %p357_p0 }
  0x16   :  { %119 = vperm.xlu1 %351, %v89_v12  }
  0x17   :  { %114 = vperm.xlu0 %350, %v88_v13  }
  0x1a   :  { %67 = vperm.xlu1 %351, %v29_v14  }
  0x1b   :  { %62 = vperm.xlu0 %350, %v28_v15  }
  0x1e   :  { %129 = vperm.xlu1 %351, %v91_v16  }
  0x1f   :  { %124 = vperm.xlu0 %350, %v90_v17  }
  0x22   :  { %159 = vperm.xlu1 %351, %v156_v18  }
  0x3d   :  { %162 = vxpose.xlu0.b32.start [1/8] (short) (narrow) %v148_v20, 8 }
  0x41   :  { %163 = vxpose.xlu0.b32.cont [2/8] (short) (narrow) %v149_v21, 8 }
  0x45   :  { %164 = vxpose.xlu0.b32.cont [3/8] (short) (narrow) %v150_v22, 8 }
  0x49   :  { %165 = vxpose.xlu0.b32.cont [4/8] (short) (narrow) %v151_v23, 8 }
  0x4d   :  { %166 = vxpose.xlu0.b32.cont [5/8] (short) (narrow) %v152_v24, 8 }
  0x51   :  { %167 = vxpose.xlu0.b32.cont [6/8] (short) (narrow) %v153_v25, 8 }
  0x55   :  { %168 = vxpose.xlu0.b32.cont [7/8] (short) (narrow) %v154_v26, 8 }
  0x59   :  { %169 = vxpose.xlu0.b32.end [8/8] (short) (narrow) %v155_v27, 8 }
  0x81   :  { %v95_v29 = vpop.permute.xlu1 %94 }
  0x82   :  { %v33_v30 = vpop.permute.xlu0 %32 }
  0x83   :  { %v76_v31 = vmul.f32 %v303_v28, %v33_v30 }
  0x85   :  { %v100_v32 = vpop.permute.xlu1 %99  ;;  %v132_v34 = vadd.f32 %v95_v29, %v76_v31 }
  0x86   :  { %v38_v33 = vpop.permute.xlu0 %37 }
  0x87   :  { %v77_v35 = vmul.f32 %v303_v28, %v38_v33  ;;  %v140_v39 = vmax.f32 %v132_v34, 0.0 }
  0x89   :  { %v133_v36 = vadd.f32 %v100_v32, %v77_v35  ;;  %v48_v37 = vpop.permute.xlu1 %47 }
  0x8a   :  { %v43_v38 = vpop.permute.xlu0 %42  ;;  %v79_v41 = vmul.f32 %v303_v28, %v48_v37 }
  0x8b   :  { %v141_v40 = vmax.f32 %v133_v36, 0.0  ;;  %v78_v42 = vmul.f32 %v303_v28, %v43_v38 }
  0x8d   :  { %v334_v43 = vpack.c.bf16 %v141_v40, %v140_v39  ;;  %v110_v44 = vpop.permute.xlu1 %109 }
  0x8e   :  { %v105_v45 = vpop.permute.xlu0 %104  ;;  %v135_v46 = vadd.f32 %v110_v44, %v79_v41 }
  0x8f   :  { %v134_v47 = vadd.f32 %v105_v45, %v78_v42  ;;  %335 = vmatpush3.bf16.msra.mxu0 %v334_v43 }
  0x90   :  { %336 = vmatprep.subr.bf16.mxu0 %v381_v9  ;;  %v143_v48 = vmax.f32 %v135_v46, 0.0 }
  0x91   :  { %v142_v49 = vmax.f32 %v134_v47, 0.0  ;;  %v58_v50 = vpop.permute.xlu1 %57 }
  0x92   :  { %v53_v51 = vpop.permute.xlu0 %52  ;;  %v81_v53 = vmul.f32 %v303_v28, %v58_v50 }
  0x93   :  { %v337_v52 = vpack.c.bf16 %v143_v48, %v142_v49  ;;  %v80_v54 = vmul.f32 %v303_v28, %v53_v51 }
  0x95   :  { %338 = vmatpush3.bf16.msra.mxu0 %v337_v52  ;;  %v120_v55 = vpop.permute.xlu1 %119 }
  0x96   :  { %v115_v56 = vpop.permute.xlu0 %114  ;;  %339 = vmatprep.subr.bf16.mxu0 %v381_v9  ;;  %v137_v57 = vadd.f32 %v120_v55, %v81_v53 }
  0x97   :  { %v136_v58 = vadd.f32 %v115_v56, %v80_v54 }
  0x98   :  { %v145_v59 = vmax.f32 %v137_v57, 0.0 }
  0x99   :  { %v144_v60 = vmax.f32 %v136_v58, 0.0  ;;  %v68_v61 = vpop.permute.xlu1 %67 }
  0x9a   :  { %v63_v62 = vpop.permute.xlu0 %62  ;;  %v83_v0 = vmul.f32 %v303_v28, %v68_v61 }
  0x9b   :  { %v340_v63 = vpack.c.bf16 %v145_v59, %v144_v60  ;;  %v82_v1 = vmul.f32 %v303_v28, %v63_v62 }
  0x9d   :  { %341 = vmatpush3.bf16.msra.mxu0 %v340_v63  ;;  %v130_v2 = vpop.permute.xlu1 %129 }
  0x9e   :  { %v125_v3 = vpop.permute.xlu0 %124  ;;  %342 = vmatprep.subr.bf16.mxu0 %v381_v9  ;;  %v139_v4 = vadd.f32 %v130_v2, %v83_v0 }
  0x9f   :  { %v138_v5 = vadd.f32 %v125_v3, %v82_v1 }
  0xa0   :  { %v147_v6 = vmax.f32 %v139_v4, 0.0 }
  0xa1   :  { %v146_v7 = vmax.f32 %v138_v5, 0.0  ;;  %v160_v11 = vpop.permute.xlu1 %159 }
  0xa3   :  { %v343_v8 = vpack.c.bf16 %v147_v6, %v146_v7 }
  0xa5   :  { %344 = vmatpush3.bf16.msra.mxu0 %v343_v8 }
  0xbd   :  { %v178_v10 = vpop.trf.xlu0 }
  0xbe   :  { %331 = vmatmul.mubr.msk.f32.vlgmr.msra.gmra.mrb[0].mxu0 %vm194_vm1, %v178_v10 }
 0x191   :  { %v264_v12 = vpop.f32.mrb[0].mxu0 }
 0x192   :  { %v265_v13 = vadd.f32 %v264_v12, %v160_v11  ;;  %v332_v14 = vpop.f32.mrb[1].mxu0 }
 0x194   :  { %v269_v15 = vsel %vm268_vm2, %v265_v13, -inf }
 0x195   :  { %v270_v16 = vrot.slane %v269_v15, 4 }
 0x197   :  { %v271_v17 = vmax.f32 %v269_v15, %v270_v16 }
 0x199   :  { %v272_v18 = vrot.slane %v271_v17, 2 }
 0x19b   :  { %v273_v19 = vmax.f32 %v271_v17, %v272_v18 }
 0x19d   :  { %v274_v9 = vrot.slane %v273_v19, 1 }
 0x19f   :  { %v275_v20 = vmax.f32 %v273_v19, %v274_v9 }
 0x1a1   :  { %v276_v21 = vsub.f32 %v265_v13, %v275_v20 }
 0x1a3   :  { %v277_v22 = vmul.f32 1.442695, %v276_v21 }
 0x1a5   :  { %352 = vpow2.f32 %v277_v22 }
 0x1af   :  { %v353_v23 = vpop.eup %352 }
 0x1b0   :  { %v279_v24 = vsel %vm268_vm2, %v353_v23, 0.0 }
 0x1b1   :  { %v280_v25 = vrot.slane %v279_v24, 4 }
 0x1b3   :  { %v281_v26 = vadd.f32 %v280_v25, %v279_v24 }
 0x1b5   :  { %v282_v27 = vrot.slane %v281_v26, 2 }
 0x1b7   :  { %v283_v28 = vadd.f32 %v282_v27, %v281_v26 }
 0x1b9   :  { %v284_v29 = vrot.slane %v283_v28, 1 }
 0x1bb   :  { %v285_v30 = vadd.f32 %v284_v29, %v283_v28 }
 0x1bd   :  { %354 = vrcp.f32 %v285_v30 }
 0x1c7   :  { %v355_v31 = vpop.eup %354 }
 0x1c8   :  { %v287_v32 = vmul.f32 %v355_v31, %v353_v23 }
 0x1ca   :  { %288 = vst [vmem:[#allocation2] sm:$0x7] %v287_v32 }
 0x1cb   :  { %367 = shalt.err (!%p364_p4)
}
 0x1cc   :  { %s368_s20 = scalar_lea.hbm %s514_s5, 64 }
 0x1cd   :  { %p369_p5 = scmp.ne.s32.totalorder %s514_s5, %s368_s20  ;;  %p372_p6 = scmp.lt.u32.totalorder %s368_s20, %s514_s5 }
 0x1cf   :  { %p374_p7 = pnand %p372_p6, %p369_p5 }
 0x1d1   :  { %377 = shalt.err (!%p374_p7)
}
 0x1d2   :  { %298 = dma.vmem_to_hbm [thread:$0]  %s296_s3, 64, %s514_s5, [#allocation3]  }
 0x1d3   :  { %378 = dma.done.wait [#allocation3], 64  }
 0x1d4   :  { %379 = vsyncadd [#allocation3], 4294967232 }
 0x1d5   :  { %302 = vsyncpa [#allocation3], 1 }

</bundles_post_ra>
